<compile_context>
chip_gen: v7x
topology: tpu7x:2x2x1
jax: 0.10.0
libtpu: 0.0.40
codegen_flags: <defaults>
</compile_context>

<pallas_src>
import functools
import math

import jax
import jax.numpy as jnp
import numpy as np
from jax.experimental import pallas as pl
from jax.experimental.pallas import tpu as pltpu


def _round_up(v, m):
    return ((v + m - 1) // m) * m


def _fused_encoder_kernel(x_ref, w_ref, s_ref, o_ref, h0, h1, cols, *,
                          kernel_size, padding, n_layers, c_in, c_out,
                          cp0, cpr, lpad, t_valid):
    """All conv+BN+ReLU stages for one batch block; activations stay in VMEM.

    x_ref: (Bt, C_in, Tk)            input block, NCW (time on lanes, Tk%128==0)
    w_ref: (L, C_out, K*C_scr)       folded conv weights (resident, compute dtype)
    s_ref: (L, C_out, 1)             folded conv-bias + BN shift (resident, f32)
    o_ref: (Bt, C_out, Tk)           output block, NCW
    h0,h1: (Bt, C_scr, lpad+Tk+pad)  ping-pong activation scratch (compute dtype)
    cols : (K*C_scr, Bt*Tk)          im2col staging scratch (compute dtype)
    """
    b_tile, _, t_k = x_ref.shape
    c_scr = h0.shape[1]
    k_sz, pad = kernel_size, padding

    # ---- per-step sanitation (megacore-safe; scratch is never fully zeroed) --
    # Halo lane columns must read as zeros for every layer's convolution.
    if pad > 0:
        h0[:, :, 0:lpad] = jnp.zeros((b_tile, c_scr, lpad), h0.dtype)
        h0[:, :, lpad + t_k:lpad + t_k + pad] = jnp.zeros(
            (b_tile, c_scr, pad), h0.dtype)
        if n_layers >= 2:
            h1[:, :, 0:lpad] = jnp.zeros((b_tile, c_scr, lpad), h1.dtype)
            h1[:, :, lpad + t_k:lpad + t_k + pad] = jnp.zeros(
                (b_tile, c_scr, pad), h1.dtype)
    # Channel rows that are read (because of 8-row alignment padding) but never
    # written must hold real zeros (their weight taps are zero, but 0*NaN=NaN).
    if cp0 > c_in:
        h0[:, c_in:cp0, lpad:lpad + t_k] = jnp.zeros(
            (b_tile, cp0 - c_in, t_k), h0.dtype)
    if n_layers >= 2 and cpr > c_out:
        h1[:, c_out:cpr, lpad:lpad + t_k] = jnp.zeros(
            (b_tile, cpr - c_out, t_k), h1.dtype)
    if n_layers >= 3 and cpr > c_out:
        h0[:, c_out:cpr, lpad:lpad + t_k] = jnp.zeros(
            (b_tile, cpr - c_out, t_k), h0.dtype)

    # ---- stage the input tile into h0's lane-aligned interior ----------------
    h0[:, 0:c_in, lpad:lpad + t_k] = x_ref[...].astype(h0.dtype)

    bufs = (h0, h1)
    for layer in range(n_layers):                 # static unroll: ping-pong sel.
        cp = cp0 if layer == 0 else cpr           # 8-aligned real input channels
        kc = k_sz * cp                            # real contraction extent
        src = bufs[layer % 2]

        # im2col staging for the whole batch tile (aligned stores: cp%8==0,
        # t_k%128==0).  Cast to the compute dtype is fused into the copy.
        for b in range(b_tile):
            col0 = b * t_k
            for k in range(k_sz):
                cols[k * cp:(k + 1) * cp, col0:col0 + t_k] = (
                    src[b, 0:cp, lpad - pad + k:lpad - pad + k + t_k]
                    .astype(cols.dtype))

        # ONE MXU matmul per layer for the whole batch tile, f32 accumulation.
        y = jnp.dot(w_ref[layer, :, 0:kc], cols[0:kc, :],
                    preferred_element_type=jnp.float32)     # (C_out, Bt*Tk) f32
        y = jnp.maximum(y + s_ref[layer], 0.0)               # f32 shift + ReLU

        if layer == n_layers - 1:
            for b in range(b_tile):
                o_ref[b] = y[:, b * t_k:(b + 1) * t_k].astype(o_ref.dtype)
        else:
            dst = bufs[(layer + 1) % 2]
            for b in range(b_tile):
                # Aligned, unmasked interior store (interior starts at lane 128).
                dst[b, 0:c_out, lpad:lpad + t_k] = (
                    y[:, b * t_k:(b + 1) * t_k].astype(dst.dtype))
                if t_valid < t_k:
                    # Re-zero the wrapper's T-padding columns so the next layer
                    # sees exact torch zero-padding semantics past the true end.
                    dst[b, 0:c_out, lpad + t_valid:lpad + t_k] = jnp.zeros(
                        (c_out, t_k - t_valid), dst.dtype)


def _pick_b_tile(batch, vmem_bytes_fn, budget_bytes, max_tile=8):
    """Largest divisor of `batch` (<= max_tile) that fits the VMEM budget and
    keeps >=2 grid steps when batch >= 2 (v7x dual-TC / megacore)."""
    best = 1
    for cand in range(1, min(batch, max_tile) + 1):
        if batch % cand:
            continue
        if vmem_bytes_fn(cand) > budget_bytes:
            continue
        if batch >= 2 and batch // cand < 2:
            continue
        best = cand
    return best


def fused_inputs_encoder(x, w_stack, s_stack, *, kernel_size, stride, padding,
                         activation_dtype=None):
    """x: (B, C_in, T) NCW.  Returns (B, C_out, T) NCW (stride must be 1)."""
    assert stride == 1, "stride > 1 not implemented in-kernel"
    # TODO(synk): support stride > 1 (strided im2col windows).
    batch, c_in, t_real = x.shape
    n_layers, c_out, kc_max = w_stack.shape
    k_sz, pad = kernel_size, padding
    cp0 = _round_up(c_in, 8)            # 8-aligned channel strides (sublanes)
    cpr = _round_up(c_out, 8)
    c_scr = max(cp0, cpr)
    assert kc_max == k_sz * c_scr, (kc_max, k_sz, c_scr)

    compute_dtype = w_stack.dtype
    act_dtype = compute_dtype if activation_dtype is None else activation_dtype

    # Lane-dense interior: pad T to a multiple of 128 (cropped after the call);
    # the kernel re-zeroes the padded tail between layers, so semantics match.
    t_k = _round_up(t_real, 128)
    if t_k != t_real:
        x = jnp.pad(x, ((0, 0), (0, 0), (0, t_k - t_real)))
    lpad = 128 if pad > 0 else 0        # 128-lane left slab -> aligned stores
    t_buf = lpad + t_k + pad
    out_dtype = x.dtype

    a_bytes = np.dtype(act_dtype).itemsize
    c_bytes = np.dtype(compute_dtype).itemsize

    def vmem_bytes(bt):                 # count ALL per-step VMEM consumers
        act = 2 * bt * c_scr * t_buf * a_bytes              # ping-pong buffers
        col = 2 * k_sz * c_scr * bt * t_k * c_bytes         # cols (+ read copy)
        acc = 2 * c_out * bt * t_k * 4                      # f32 matmul result
        wts = 2 * n_layers * c_out * kc_max * c_bytes       # weights (pipe x2)
        sft = 2 * n_layers * c_out * 4
        xin = 2 * bt * c_in * t_k * np.dtype(x.dtype).itemsize
        out = 2 * bt * c_out * t_k * np.dtype(out_dtype).itemsize
        return act + col + acc + wts + sft + xin + out + (1 << 20)

    b_tile = _pick_b_tile(batch, vmem_bytes, budget_bytes=40 << 20)
    grid = (batch // b_tile,)
    vmem_limit = int(min(max(vmem_bytes(b_tile) * 5 // 4, 32 << 20), 96 << 20))

    kern = functools.partial(
        _fused_encoder_kernel, kernel_size=k_sz, padding=pad,
        n_layers=n_layers, c_in=c_in, c_out=c_out, cp0=cp0, cpr=cpr,
        lpad=lpad, t_valid=t_real)

    # TODO(synk): add a T-tile grid axis (halo = n_layers*pad per side) for very
    # long sequences / batch==1 so both v7x TensorCores get work without
    # shrinking b_tile to 1.
    out = pl.pallas_call(
        kern,
        out_shape=jax.ShapeDtypeStruct((batch, c_out, t_k), out_dtype),
        grid_spec=pltpu.PrefetchScalarGridSpec(
            num_scalar_prefetch=0,
            grid=grid,
            in_specs=[
                pl.BlockSpec((b_tile, c_in, t_k), lambda i: (i, 0, 0)),
                # Constant index_map -> weights/shifts DMA'd once, VMEM-resident.
                # TODO(synk): pipeline_mode=pl.Buffered(1) would drop the unused
                # second pipeline buffer for these resident arrays.
                pl.BlockSpec((n_layers, c_out, kc_max), lambda i: (0, 0, 0)),
                pl.BlockSpec((n_layers, c_out, 1), lambda i: (0, 0, 0)),
            ],
            out_specs=pl.BlockSpec((b_tile, c_out, t_k), lambda i: (i, 0, 0)),
            scratch_shapes=[
                pltpu.VMEM((b_tile, c_scr, t_buf), act_dtype),
                pltpu.VMEM((b_tile, c_scr, t_buf) if n_layers > 1
                           else (1, 8, 128), act_dtype),
                pltpu.VMEM((k_sz * c_scr, b_tile * t_k), compute_dtype),
            ],
        ),
        compiler_params=pltpu.CompilerParams(
            dimension_semantics=("parallel",),
            vmem_limit_bytes=vmem_limit),
    )(x, w_stack, s_stack)

    if t_k != t_real:
        out = out[:, :, :t_real]
    return out


class InputsEncoderPallas:
    """JAX/Pallas port of InputsEncoder (inference semantics)."""

    def __init__(self, ninputs, conv_channels, kernel_size, stride,
                 n_convolutions, dropout, key, compute_dtype=jnp.bfloat16,
                 activation_dtype=None):
        assert kernel_size % 2 == 1
        self.kernel_size = kernel_size
        self.stride = stride
        self.n_convolutions = n_convolutions
        self.dropout = dropout                 # identity in eval mode
        self.padding = int((kernel_size - 1) / 2)
        self.compute_dtype = compute_dtype
        self.activation_dtype = activation_dtype
        self.conv_channels = conv_channels
        self.ninputs = ninputs

        bn_eps = 1e-5
        gain = 5.0 / 3.0                       # torch.nn.init.calculate_gain('tanh')
        cp0 = _round_up(ninputs, 8)
        cpr = _round_up(conv_channels, 8)
        c_scr = max(cp0, cpr)
        kc_max = kernel_size * c_scr

        self._raw_params = []                  # (W (C_out,C_in,K), bias) per layer
        w_layers, s_layers = [], []
        c_in = ninputs
        for li in range(n_convolutions):
            key, wk, bk = jax.random.split(key, 3)
            fan_in = c_in * kernel_size
            fan_out = conv_channels * kernel_size
            # Xavier-uniform conv weight, torch layout (C_out, C_in, K).
            limit = gain * math.sqrt(6.0 / (fan_in + fan_out))
            w = jax.random.uniform(wk, (conv_channels, c_in, kernel_size),
                                   jnp.float32, -limit, limit)
            # Conv1d default bias init: U(-1/sqrt(fan_in), 1/sqrt(fan_in)).
            blim = 1.0 / math.sqrt(fan_in)
            bias = jax.random.uniform(bk, (conv_channels,), jnp.float32,
                                      -blim, blim)
            # BatchNorm1d (eval, fresh stats): gamma=1, beta=0, mean=0, var=1.
            gamma = jnp.ones((conv_channels,), jnp.float32)
            beta = jnp.zeros((conv_channels,), jnp.float32)
            run_mean = jnp.zeros((conv_channels,), jnp.float32)
            run_var = jnp.ones((conv_channels,), jnp.float32)

            scale = gamma / jnp.sqrt(run_var + bn_eps)             # (C_out,)
            shift = (bias - run_mean) * scale + beta               # (C_out,)
            w_eff = w * scale[:, None, None]                       # fold BN scale

            # im2col layout (k-major, 8-aligned per-layer channel stride):
            #   contraction index = k * cp + c   <->   cols[k*cp + c, t]
            cp = cp0 if li == 0 else cpr
            w_kc = jnp.transpose(w_eff, (0, 2, 1))          # (C_out, K, C_in_l)
            w_kc = jnp.pad(w_kc, ((0, 0), (0, 0), (0, cp - c_in)))
            w_kc = w_kc.reshape(conv_channels, kernel_size * cp)
            w_kc = jnp.pad(w_kc, ((0, 0), (0, kc_max - kernel_size * cp)))
            w_layers.append(w_kc)
            s_layers.append(shift.reshape(conv_channels, 1))
            self._raw_params.append((w, bias))
            c_in = conv_channels

        self.w_stack = jnp.stack(w_layers, 0).astype(compute_dtype)  # (L,Co,K*Cs)
        self.s_stack = jnp.stack(s_layers, 0).astype(jnp.float32)    # (L,Co,1)

    def __call__(self, x, input_lengths, max_length=None):
        """x: (B, C_in, T), PyTorch NCW convention.  Output stays NCW."""
        out = fused_inputs_encoder(
            x, self.w_stack, self.s_stack,
            kernel_size=self.kernel_size, stride=self.stride,
            padding=self.padding, activation_dtype=self.activation_dtype)
        # F.dropout(..., training=False) is the identity in eval mode.

        # Length bookkeeping (legacy torch.div == floor division on ints here).
        conv_length = input_lengths
        total_length = max_length
        p, k, s = self.padding, self.kernel_size, self.stride
        for _ in range(self.n_convolutions):
            conv_length = (conv_length + 2 * p - (k - 1) - 1) // s + 1
            if total_length is not None:
                total_length = (total_length + 2 * p - (k - 1) - 1) // s + 1
        return out, conv_length, total_length

    def reference_forward(self, x):
        """Pure-JAX (XLA, f32) reference with identical parameters."""
        bn_eps = 1e-5
        h = x
        for w, bias in self._raw_params:
            y = jax.lax.conv_general_dilated(
                h, w, window_strides=(self.stride,),
                padding=[(self.padding, self.padding)],
                dimension_numbers=("NCH", "OIH", "NCH"))
            y = y + bias[None, :, None]
            # BatchNorm1d eval with fresh stats (mean=0, var=1, gamma=1, beta=0).
            y = y / jnp.sqrt(1.0 + bn_eps)
            h = jnp.maximum(y, 0.0)
        return h


if __name__ == "__main__":
    key = jax.random.PRNGKey(0)
    key, xk = jax.random.split(key)

    # Small, module-consistent shapes.
    B, ninputs, T = 2, 4, 16
    conv_channels, kernel_size, stride = 32, 3, 1
    n_convolutions, dropout = 2, 0.5

    x = jax.random.normal(xk, (B, ninputs, T), jnp.float32)     # (B, C_in, T)
    input_lengths = jnp.array([16, 12], dtype=jnp.int32)
    max_length = T

    enc = InputsEncoderPallas(ninputs, conv_channels, kernel_size, stride,
                              n_convolutions, dropout, key)
    y, conv_len, total_len = enc(x, input_lengths, max_length)
    y = jax.block_until_ready(y)
    conv_len = jax.block_until_ready(conv_len)

    assert y.shape == (B, conv_channels, T), y.shape
    assert bool(jnp.all(y >= 0.0))                # ReLU output
    assert conv_len.shape == (B,)
    assert bool(jnp.array_equal(conv_len, input_lengths))  # stride=1, same pad
    assert total_len == T

    # Numerical check against the pure-JAX f32 reference (tolerance covers the
    # bf16 matmul inputs / bf16 inter-layer activations; accumulation is f32).
    ref = jax.block_until_ready(enc.reference_forward(x))
    np.testing.assert_allclose(np.asarray(y), np.asarray(ref),
                               rtol=5e-2, atol=5e-2)

    print("KERNEL_OK")
</pallas_src>

<mosaic_0001>
module attributes {stable_mosaic.version = 11 : i64} {
  func.func @_fused_encoder_kernel(%arg0: i32, %arg1: memref<1x4x128xf32, #tpu.memory_space<vmem>>, %arg2: memref<2x32x96xbf16, #tpu.memory_space<vmem>>, %arg3: memref<2x32x1xf32, #tpu.memory_space<vmem>>, %arg4: memref<1x32x128xf32, #tpu.memory_space<vmem>>, %arg5: memref<1x32x257xbf16, #tpu.memory_space<vmem>>, %arg6: memref<1x32x257xbf16, #tpu.memory_space<vmem>>, %arg7: memref<96x128xbf16, #tpu.memory_space<vmem>>) attributes {dimension_semantics = [#tpu.dimension_semantics<parallel>], iteration_bounds = array<i64: 2>, scalar_prefetch = 0 : i64, scratch_operands = 3 : i64, tpu.core_type = #tpu.core_type<tc>, window_params = [{transform_indices = @transform_0, window_bounds = array<i64: 1, 4, 128>}, {pipeline_mode = #tpu.pipeline_mode<synchronous>, transform_indices = @transform_1, window_bounds = array<i64: 2, 32, 96>}, {pipeline_mode = #tpu.pipeline_mode<synchronous>, transform_indices = @transform_2, window_bounds = array<i64: 2, 32, 1>}, {transform_indices = @transform_3, window_bounds = array<i64: 1, 32, 128>}]} {
    %cst = arith.constant 0.000000e+00 : bf16
    %0 = vector.broadcast %cst : bf16 to vector<1x32x128xbf16>
    %c0 = arith.constant 0 : index
    %c0_0 = arith.constant 0 : index
    %c0_1 = arith.constant 0 : index
    %1 = vector.load %arg5[%c0, %c0_0, %c0_1] : memref<1x32x257xbf16, #tpu.memory_space<vmem>>, vector<1x32x128xbf16>
    tpu.vector_store %arg5[%c0, %c0_0, %c0_1], %0 {strides = array<i32>} : memref<1x32x257xbf16, #tpu.memory_space<vmem>>, vector<1x32x128xbf16>,
    %cst_2 = arith.constant 0.000000e+00 : bf16
    %2 = vector.broadcast %cst_2 : bf16 to vector<1x32x1xbf16>
    %c0_3 = arith.constant 0 : index
    %c0_4 = arith.constant 0 : index
    %c256 = arith.constant 256 : index
    %3 = vector.load %arg5[%c0_3, %c0_4, %c256] : memref<1x32x257xbf16, #tpu.memory_space<vmem>>, vector<1x32x1xbf16>
    tpu.vector_store %arg5[%c0_3, %c0_4, %c256], %2 {strides = array<i32>} : memref<1x32x257xbf16, #tpu.memory_space<vmem>>, vector<1x32x1xbf16>,
    %cst_5 = arith.constant 0.000000e+00 : bf16
    %4 = vector.broadcast %cst_5 : bf16 to vector<1x32x128xbf16>
    %c0_6 = arith.constant 0 : index
    %c0_7 = arith.constant 0 : index
    %c0_8 = arith.constant 0 : index
    %5 = vector.load %arg6[%c0_6, %c0_7, %c0_8] : memref<1x32x257xbf16, #tpu.memory_space<vmem>>, vector<1x32x128xbf16>
    tpu.vector_store %arg6[%c0_6, %c0_7, %c0_8], %4 {strides = array<i32>} : memref<1x32x257xbf16, #tpu.memory_space<vmem>>, vector<1x32x128xbf16>,
    %cst_9 = arith.constant 0.000000e+00 : bf16
    %6 = vector.broadcast %cst_9 : bf16 to vector<1x32x1xbf16>
    %c0_10 = arith.constant 0 : index
    %c0_11 = arith.constant 0 : index
    %c256_12 = arith.constant 256 : index
    %7 = vector.load %arg6[%c0_10, %c0_11, %c256_12] : memref<1x32x257xbf16, #tpu.memory_space<vmem>>, vector<1x32x1xbf16>
    tpu.vector_store %arg6[%c0_10, %c0_11, %c256_12], %6 {strides = array<i32>} : memref<1x32x257xbf16, #tpu.memory_space<vmem>>, vector<1x32x1xbf16>,
    %cst_13 = arith.constant 0.000000e+00 : bf16
    %8 = vector.broadcast %cst_13 : bf16 to vector<1x4x128xbf16>
    %c0_14 = arith.constant 0 : index
    %c4 = arith.constant 4 : index
    %c128 = arith.constant 128 : index
    %9 = vector.load %arg5[%c0_14, %c4, %c128] : memref<1x32x257xbf16, #tpu.memory_space<vmem>>, vector<1x4x128xbf16>
    tpu.vector_store %arg5[%c0_14, %c4, %c128], %8 {strides = array<i32>} : memref<1x32x257xbf16, #tpu.memory_space<vmem>>, vector<1x4x128xbf16>,
    %c0_15 = arith.constant 0 : index
    %c0_16 = arith.constant 0 : index
    %c0_17 = arith.constant 0 : index
    %10 = vector.load %arg1[%c0_15, %c0_16, %c0_17] : memref<1x4x128xf32, #tpu.memory_space<vmem>>, vector<1x4x128xf32>
    %11 = arith.truncf %10 : vector<1x4x128xf32> to vector<1x4x128xbf16>
    %c0_18 = arith.constant 0 : index
    %c0_19 = arith.constant 0 : index
    %c128_20 = arith.constant 128 : index
    %12 = vector.load %arg5[%c0_18, %c0_19, %c128_20] : memref<1x32x257xbf16, #tpu.memory_space<vmem>>, vector<1x4x128xbf16>
    tpu.vector_store %arg5[%c0_18, %c0_19, %c128_20], %11 {strides = array<i32>} : memref<1x32x257xbf16, #tpu.memory_space<vmem>>, vector<1x4x128xbf16>,
    %c0_21 = arith.constant 0 : index
    %c0_22 = arith.constant 0 : index
    %c127 = arith.constant 127 : index
    %13 = vector.load %arg5[%c0_21, %c0_22, %c127] : memref<1x32x257xbf16, #tpu.memory_space<vmem>>, vector<1x8x128xbf16>
    %14 = vector.shape_cast %13 : vector<1x8x128xbf16> to vector<8x128xbf16>
    %c0_23 = arith.constant 0 : index
    %c0_24 = arith.constant 0 : index
    %15 = vector.load %arg7[%c0_23, %c0_24] : memref<96x128xbf16, #tpu.memory_space<vmem>>, vector<8x128xbf16>
    tpu.vector_store %arg7[%c0_23, %c0_24], %14 {strides = array<i32>} : memref<96x128xbf16, #tpu.memory_space<vmem>>, vector<8x128xbf16>,
    %c0_25 = arith.constant 0 : index
    %c0_26 = arith.constant 0 : index
    %c128_27 = arith.constant 128 : index
    %16 = vector.load %arg5[%c0_25, %c0_26, %c128_27] : memref<1x32x257xbf16, #tpu.memory_space<vmem>>, vector<1x8x128xbf16>
    %17 = vector.shape_cast %16 : vector<1x8x128xbf16> to vector<8x128xbf16>
    %c8 = arith.constant 8 : index
    %c0_28 = arith.constant 0 : index
    %18 = vector.load %arg7[%c8, %c0_28] : memref<96x128xbf16, #tpu.memory_space<vmem>>, vector<8x128xbf16>
    tpu.vector_store %arg7[%c8, %c0_28], %17 {strides = array<i32>} : memref<96x128xbf16, #tpu.memory_space<vmem>>, vector<8x128xbf16>,
    %c0_29 = arith.constant 0 : index
    %c0_30 = arith.constant 0 : index
    %c129 = arith.constant 129 : index
    %19 = vector.load %arg5[%c0_29, %c0_30, %c129] : memref<1x32x257xbf16, #tpu.memory_space<vmem>>, vector<1x8x128xbf16>
    %20 = vector.shape_cast %19 : vector<1x8x128xbf16> to vector<8x128xbf16>
    %c16 = arith.constant 16 : index
    %c0_31 = arith.constant 0 : index
    %21 = vector.load %arg7[%c16, %c0_31] : memref<96x128xbf16, #tpu.memory_space<vmem>>, vector<8x128xbf16>
    tpu.vector_store %arg7[%c16, %c0_31], %20 {strides = array<i32>} : memref<96x128xbf16, #tpu.memory_space<vmem>>, vector<8x128xbf16>,
    %c0_32 = arith.constant 0 : index
    %c0_33 = arith.constant 0 : index
    %c0_34 = arith.constant 0 : index
    %22 = vector.load %arg2[%c0_32, %c0_33, %c0_34] : memref<2x32x96xbf16, #tpu.memory_space<vmem>>, vector<1x32x24xbf16>
    %23 = vector.shape_cast %22 : vector<1x32x24xbf16> to vector<32x24xbf16>
    %c0_35 = arith.constant 0 : index
    %c0_36 = arith.constant 0 : index
    %24 = vector.load %arg7[%c0_35, %c0_36] : memref<96x128xbf16, #tpu.memory_space<vmem>>, vector<24x128xbf16>
    %cst_37 = arith.constant dense<0.000000e+00> : vector<32x128xf32>
    %25 = tpu.matmul %23, %24, %cst_37 {dimension_numbers = #tpu.dot_dimension_numbers<[1], [0], [0], [1], [0, 0, 1, 1], [], []>} : vector<32x24xbf16>, vector<24x128xbf16>, vector<32x128xf32> -> vector<32x128xf32>
    %c0_38 = arith.constant 0 : index
    %c0_39 = arith.constant 0 : index
    %c0_40 = arith.constant 0 : index
    %26 = vector.load %arg3[%c0_38, %c0_39, %c0_40] : memref<2x32x1xf32, #tpu.memory_space<vmem>>, vector<1x32x1xf32>
    %27 = vector.shape_cast %26 : vector<1x32x1xf32> to vector<32x1xf32>
    %28 = vector.broadcast %27 : vector<32x1xf32> to vector<32x128xf32>
    %29 = arith.addf %25, %28 : vector<32x128xf32>
    %cst_41 = arith.constant 0.000000e+00 : f32
    %30 = vector.broadcast %cst_41 : f32 to vector<32x128xf32>
    %31 = arith.maximumf %29, %30 : vector<32x128xf32>
    %32 = arith.truncf %31 : vector<32x128xf32> to vector<32x128xbf16>
    %c0_42 = arith.constant 0 : index
    %c0_43 = arith.constant 0 : index
    %c128_44 = arith.constant 128 : index
    %33 = vector.load %arg6[%c0_42, %c0_43, %c128_44] : memref<1x32x257xbf16, #tpu.memory_space<vmem>>, vector<1x32x128xbf16>
    %34 = vector.shape_cast %33 : vector<1x32x128xbf16> to vector<32x128xbf16>
    %35 = vector.shape_cast %32 : vector<32x128xbf16> to vector<1x32x128xbf16>
    tpu.vector_store %arg6[%c0_42, %c0_43, %c128_44], %35 {strides = array<i32>} : memref<1x32x257xbf16, #tpu.memory_space<vmem>>, vector<1x32x128xbf16>,
    %cst_45 = arith.constant 0.000000e+00 : bf16
    %36 = vector.broadcast %cst_45 : bf16 to vector<32x112xbf16>
    %c0_46 = arith.constant 0 : index
    %c0_47 = arith.constant 0 : index
    %c144 = arith.constant 144 : index
    %37 = vector.load %arg6[%c0_46, %c0_47, %c144] : memref<1x32x257xbf16, #tpu.memory_space<vmem>>, vector<1x32x112xbf16>
    %38 = vector.shape_cast %37 : vector<1x32x112xbf16> to vector<32x112xbf16>
    %39 = vector.shape_cast %36 : vector<32x112xbf16> to vector<1x32x112xbf16>
    tpu.vector_store %arg6[%c0_46, %c0_47, %c144], %39 {strides = array<i32>} : memref<1x32x257xbf16, #tpu.memory_space<vmem>>, vector<1x32x112xbf16>,
    %c0_48 = arith.constant 0 : index
    %c0_49 = arith.constant 0 : index
    %c127_50 = arith.constant 127 : index
    %40 = vector.load %arg6[%c0_48, %c0_49, %c127_50] : memref<1x32x257xbf16, #tpu.memory_space<vmem>>, vector<1x32x128xbf16>
    %41 = vector.shape_cast %40 : vector<1x32x128xbf16> to vector<32x128xbf16>
    %c0_51 = arith.constant 0 : index
    %c0_52 = arith.constant 0 : index
    %42 = vector.load %arg7[%c0_51, %c0_52] : memref<96x128xbf16, #tpu.memory_space<vmem>>, vector<32x128xbf16>
    tpu.vector_store %arg7[%c0_51, %c0_52], %41 {strides = array<i32>} : memref<96x128xbf16, #tpu.memory_space<vmem>>, vector<32x128xbf16>,
    %c0_53 = arith.constant 0 : index
    %c0_54 = arith.constant 0 : index
    %c128_55 = arith.constant 128 : index
    %43 = vector.load %arg6[%c0_53, %c0_54, %c128_55] : memref<1x32x257xbf16, #tpu.memory_space<vmem>>, vector<1x32x128xbf16>
    %44 = vector.shape_cast %43 : vector<1x32x128xbf16> to vector<32x128xbf16>
    %c32 = arith.constant 32 : index
    %c0_56 = arith.constant 0 : index
    %45 = vector.load %arg7[%c32, %c0_56] : memref<96x128xbf16, #tpu.memory_space<vmem>>, vector<32x128xbf16>
    tpu.vector_store %arg7[%c32, %c0_56], %44 {strides = array<i32>} : memref<96x128xbf16, #tpu.memory_space<vmem>>, vector<32x128xbf16>,
    %c0_57 = arith.constant 0 : index
    %c0_58 = arith.constant 0 : index
    %c129_59 = arith.constant 129 : index
    %46 = vector.load %arg6[%c0_57, %c0_58, %c129_59] : memref<1x32x257xbf16, #tpu.memory_space<vmem>>, vector<1x32x128xbf16>
    %47 = vector.shape_cast %46 : vector<1x32x128xbf16> to vector<32x128xbf16>
    %c64 = arith.constant 64 : index
    %c0_60 = arith.constant 0 : index
    %48 = vector.load %arg7[%c64, %c0_60] : memref<96x128xbf16, #tpu.memory_space<vmem>>, vector<32x128xbf16>
    tpu.vector_store %arg7[%c64, %c0_60], %47 {strides = array<i32>} : memref<96x128xbf16, #tpu.memory_space<vmem>>, vector<32x128xbf16>,
    %c1 = arith.constant 1 : index
    %c0_61 = arith.constant 0 : index
    %c0_62 = arith.constant 0 : index
    %49 = vector.load %arg2[%c1, %c0_61, %c0_62] : memref<2x32x96xbf16, #tpu.memory_space<vmem>>, vector<1x32x96xbf16>
    %50 = vector.shape_cast %49 : vector<1x32x96xbf16> to vector<32x96xbf16>
    %c0_63 = arith.constant 0 : index
    %c0_64 = arith.constant 0 : index
    %51 = vector.load %arg7[%c0_63, %c0_64] : memref<96x128xbf16, #tpu.memory_space<vmem>>, vector<96x128xbf16>
    %cst_65 = arith.constant dense<0.000000e+00> : vector<32x128xf32>
    %52 = tpu.matmul %50, %51, %cst_65 {dimension_numbers = #tpu.dot_dimension_numbers<[1], [0], [0], [1], [0, 0, 1, 1], [], []>} : vector<32x96xbf16>, vector<96x128xbf16>, vector<32x128xf32> -> vector<32x128xf32>
    %c1_66 = arith.constant 1 : index
    %c0_67 = arith.constant 0 : index
    %c0_68 = arith.constant 0 : index
    %53 = vector.load %arg3[%c1_66, %c0_67, %c0_68] : memref<2x32x1xf32, #tpu.memory_space<vmem>>, vector<1x32x1xf32>
    %54 = vector.shape_cast %53 : vector<1x32x1xf32> to vector<32x1xf32>
    %55 = vector.broadcast %54 : vector<32x1xf32> to vector<32x128xf32>
    %56 = arith.addf %52, %55 : vector<32x128xf32>
    %cst_69 = arith.constant 0.000000e+00 : f32
    %57 = vector.broadcast %cst_69 : f32 to vector<32x128xf32>
    %58 = arith.maximumf %56, %57 : vector<32x128xf32>
    %c0_70 = arith.constant 0 : index
    %c0_71 = arith.constant 0 : index
    %c0_72 = arith.constant 0 : index
    %59 = vector.load %arg4[%c0_70, %c0_71, %c0_72] : memref<1x32x128xf32, #tpu.memory_space<vmem>>, vector<1x32x128xf32>
    %60 = vector.shape_cast %59 : vector<1x32x128xf32> to vector<32x128xf32>
    %61 = vector.shape_cast %58 : vector<32x128xf32> to vector<1x32x128xf32>
    tpu.vector_store %arg4[%c0_70, %c0_71, %c0_72], %61 {strides = array<i32>} : memref<1x32x128xf32, #tpu.memory_space<vmem>>, vector<1x32x128xf32>,
    return
  }
  func.func @transform_0(%arg0: i32) -> (i32, i32, i32) {
    %c0_i32 = arith.constant 0 : i32
    %c0_i32_0 = arith.constant 0 : i32
    %c0_i32_1 = arith.constant 0 : i32
    return %arg0, %c0_i32, %c0_i32_0 : i32, i32, i32
  }
  func.func @transform_1(%arg0: i32) -> (i32, i32, i32) {
    %c0_i32 = arith.constant 0 : i32
    %c0_i32_0 = arith.constant 0 : i32
    %c0_i32_1 = arith.constant 0 : i32
    %c0_i32_2 = arith.constant 0 : i32
    return %c0_i32, %c0_i32_0, %c0_i32_1 : i32, i32, i32
  }
  func.func @transform_2(%arg0: i32) -> (i32, i32, i32) {
    %c0_i32 = arith.constant 0 : i32
    %c0_i32_0 = arith.constant 0 : i32
    %c0_i32_1 = arith.constant 0 : i32
    %c0_i32_2 = arith.constant 0 : i32
    return %c0_i32, %c0_i32_0, %c0_i32_1 : i32, i32, i32
  }
  func.func @transform_3(%arg0: i32) -> (i32, i32, i32) {
    %c0_i32 = arith.constant 0 : i32
    %c0_i32_0 = arith.constant 0 : i32
    %c0_i32_1 = arith.constant 0 : i32
    return %arg0, %c0_i32, %c0_i32_0 : i32, i32, i32
  }
}

</mosaic_0001>

<bundles_post_ra>
// kernel: tpu_custom_call.1
= control target key start
LH: loop header
LB: loop body
LE: loop exit
PB: predicated region body
PF: predicated region fallthrough
CT: control target
= control target key end

     0   :  { %8 = vsyncpa [#allocation6], 0  ;;  %s934_s0 = inlined_call_operand.vmem [shape: f32[2,4,128], index: 0, kind: input, shape index: {}]   ;;  %s935_s1 = inlined_call_operand.vmem [shape: bf16[2,32,96], index: 1, kind: input, shape index: {}]   ;;  %s936_s2 = inlined_call_operand.vmem [shape: f32[2,32,1], index: 2, kind: input, shape index: {}]   ;;  %s937_s3 = inlined_call_operand.hbm [shape: f32[2,32,128], index: 3, kind: output, shape index: {}]  }
   0x1   :  { %10 = vsyncpa [#allocation6 + $0x1], 0  ;;  %s759_s12 = smov 0   ;;  %s761_s13 = smov 0  }
   0x2   :  { %s763_s14 = smov 0   ;;  %s765_s15 = smov 0  }
   0x3 LB: > { %s780_s16 = sadd.s32 4294967295, %s731_s15   ;;  %s554_s17 = sadd.s32 4294967294, %s731_s15   ;;  %s731_s15 = sphi %s765_s15, %s943_s15   ;;  %s727_s14 = sphi %s763_s14, %s942_s14   ;;  %s723_s13 = sphi %s761_s13, %s941_s13   ;;  %s719_s12 = sphi %s759_s12, %s940_s12  }
   0x4   : > { %s784_s18 = sadd.s32 1, %s731_s15   ;;  %s91_s19 = sadd.s32 1, %s727_s14 }
   0x5   : > { %s88_s20 = ssub.s32 %s731_s15, %s784_s18  ;;  %p101_p0 = scmp.ne.s32.totalorder %s727_s14, %s723_s13 }
   0x6   : > { %p89_p1 = scmp.eq.s32.totalorder %s88_s20, 0  ;;  %p102_p2 = scmp.eq.s32.totalorder %s780_s16, 1 }
   0x7   : > { %p107_p3 = scmp.ne.s32.totalorder %s723_s13, %s719_s12  ;;  %p108_p4 = scmp.eq.s32.totalorder %s554_s17, 1 }
   0x8   : > { %s795_s21 = scalar_select %p89_p1, %s727_s14, %s91_s19  }
   0x9   : > { %p797_p5 = por %p102_p2, %p101_p0  ;;  %p801_p6 = por %p108_p4, %p107_p3 }
   0xa   : > { %p557_p7 = scmp.ge.s32.totalorder %s731_s15, 1  ;;  %p139_p8 = scmp.lt.s32.totalorder %s731_s15, 3 }
   0xc   : > { %p140_p9 = pnand %p557_p7, %p139_p8 }
   0xd   : > { %p162_p10 = scmp.lt.s32.totalorder (!%p140_p9), %s780_s16, 1  ;;  %vm169_vm0 = vcmask (!%p140_p9), 7168   ;;  %v733_v0 = vmov (!%p140_p9), 0   ;;  %s734_s29 = smov (!%p140_p9), 1   ;;  %v665_v9 = vld [vmem:[%s935_s1] sm:$0xff] (!%p140_p9)   ;;  %vm249_vm1 = vcmask (!%p140_p9), 195584  }
   0xe   : > { %143 = sbr.rel (%p140_p9) target bundleno = 773 (0x305), region = 32  ;;  %167 = vst [vmem:[#allocation2] sm:$0xff] (!%p140_p9), %v733_v0  ;;  %176 = vst [vmem:[#allocation2 + $0x8] sm:$0xc] (!%p140_p9), %v733_v0  ;;  %664 = vset.pattern.permute.xlu1 (!%p140_p9), %v733_v0  ;;  %663 = vset.pattern.permute.xlu0 (!%p140_p9), %v733_v0  ;;  %s735_s30 = smov (!%p140_p9), 127   ;;  %v215_v10 = vld [vmem:[%s936_s2] sm:$0xff] (!%p140_p9) }
   0xf   : > { %170 = vst.msk [vmem:[#allocation2 + $0x10] sm:$0xff] (!%p140_p9), %vm169_vm0, %v733_v0  ;;  %174 = vst.msk [vmem:[#allocation3 + $0x10] sm:$0xff] (!%p140_p9), %vm169_vm0, %v733_v0  ;;  %598 = vmatprep.mubr.msk.bf16.mxu0 (!%p140_p9), %vm249_vm1, %v665_v9  ;;  %v216_v11 = vld [vmem:[%s936_s2 + $0x8] sm:$0xff] (!%p140_p9)  ;;  %v218_v12 = vld [vmem:[%s936_s2 + $0x18] sm:$0xff] (!%p140_p9)  ;;  %vm205_vm2 = vcmask (!%p140_p9), 1039360   ;;  %vm256_vm3 = vcmask (!%p140_p9), 1043456  }
  0x10   : > { %175 = vst.msk [vmem:[#allocation3 + $0x28] sm:$0xff] (!%p140_p9), %vm169_vm0, %v733_v0  ;;  %v217_v13 = vld [vmem:[%s936_s2 + $0x10] sm:$0xff] (!%p140_p9)  ;;  %v666_v23 = vld [vmem:[%s935_s1 + $0x8] sm:$0xff] (!%p140_p9)   ;;  %vm317_vm4 = vcmask (!%p140_p9), 1047680   ;;  %v568_v44 = vld [vmem:[%s936_s2 + $0x20] sm:$0xff] (!%p140_p9)  ;;  %vm414_vm5 = vcmask (!%p140_p9), 785408  }
  0x11   : > { %v570_v46 = vld [vmem:[%s936_s2 + $0x30] sm:$0xff] (!%p140_p9)  ;;  %v569_v49 = vld [vmem:[%s936_s2 + $0x28] sm:$0xff] (!%p140_p9)  ;;  %v571_v50 = vld [vmem:[%s936_s2 + $0x38] sm:$0xff] (!%p140_p9)  ;;  %s159_s10 = sand.u32 (!%p140_p9), 1, %s723_s13   ;;  %s581_s20 = sshll.u32 (!%p140_p9), %s780_s16, 9 }
  0x12   : > { %v667_v48 = vld [vmem:[%s935_s1 + $0x10] sm:$0xff] (!%p140_p9)   ;;  %v668_v63 = vld [vmem:[%s935_s1 + $0x18] sm:$0xff] (!%p140_p9)   ;;  %s558_s11 = sshll.u32 (!%p140_p9), %s159_s10, 5  ;;  %s891_s26 = scalar_lea.hbm (!%p140_p9), %s937_s3, %s581_s20 }
  0x13   : > { %614 = vmatprep.mubr.msk.bf16.mxu1 (!%p140_p9), %vm414_vm5, %v667_v48  ;;  %s161_s17 = scalar_lea.vmem (!%p140_p9), [#allocation5], %s558_s11 }
  0x14   : > { %s492_s19 = sshll.u32 (!%p140_p9), %s161_s17, 4  ;;  %s886_s19 = int_to_ptr.vmem [resolvable:$true] %s492_s19 }
  0x15   : > { %s163_s24 = scalar_select %p162_p10, %s780_s16, 1  ;;  %v180_v3 = vld [vmem:[#allocation2] sm:$0xf] }
  0x16   : > { %184 = vrot.lane.b32.xlu0 %v180_v3, %s734_s29  ;;  %v198_v8 = vld [vmem:[#allocation2 + $0x10] sm:$0xf]  ;;  %v347_v45 = vld [vmem:[#allocation3 + $0x10] sm:$0xff]  ;;  %s893_s16 = scalar_lea.sflag [#allocation6], %s159_s10  ;;  %s669_s27 = scalar_lea.vmem %s886_s19, 512 }
  0x17   : > { %s559_s25 = sshll.u32 %s163_s24, 2  ;;  %v349_v47 = vld [vmem:[#allocation3 + $0x28] sm:$0xff]  ;;  %p670_p11 = scmp.ne.s32.totalorder %s886_s19, %s669_s27 }
  0x18   : > { %s165_s28 = scalar_lea.vmem %s934_s0, %s559_s25 }
  0x19   : > { %v177_v1 = vld [vmem:[%s165_s28] sm:$0xf]  ;;  %p671_p12 = pnand %p670_p11, %p797_p5  ;;  %s736_s28 = smov [#allocation5]  }
  0x1a   : > { %v178_v2 = vpack.c.bf16 %v177_v1, %v177_v1  ;;  %s673_s4 = sshll.u32 %s736_s28, 4  ;;  %s674_s4 = int_to_ptr.vmem [resolvable:$false] %s673_s4 }
  0x1b   : > { %p672_p13 = pneg %p671_p12  ;;  %s675_s5 = scalar_lea.vmem %s674_s4, 1024 }
  0x1c   : > { %179 = vst [vmem:[#allocation2 + $0x8] sm:$0x3] %v178_v2  ;;  %p676_p0 = scmp.lt.s32.totalorder %s886_s19, %s674_s4  ;;  %p677_p1 = scmp.lt.s32.totalorder %s675_s5, %s669_s27 }
  0x1e   : > { %p678_p2 = por %p677_p1, %p676_p0 }
  0x20   : > { %p679_p3 = pnand %p678_p2, %p672_p13 }
  0x23   : > { %v197_v4 = vld [vmem:[#allocation2 + $0x8] sm:$0xf] }
  0x24   : > { %v181_v5 = vld [vmem:[#allocation2 + $0x8] sm:$0xf]  ;;  %201 = vrot.lane.b32.xlu1 %v197_v4, %s735_s30 }
  0x25   : > { %v192_v6 = vld [vmem:[#allocation2 + $0x8] sm:$0xf]  ;;  %186 = vrot.lane.b32.xlu0 %v181_v5, %s734_s29 }
  0x26   : > { %v194_v7 = vrot.slane %v192_v6, 4 }
  0x28   : > { %196 = vst [vmem:[#allocation4] sm:$0xf0] %v194_v7  ;;  %203 = vrot.lane.b32.xlu1 %v198_v8, %s735_s30 }
  0x29   : > { %221 = vperm.xlu0 %663, %v215_v10  }
  0x2c   : > { %226 = vperm.xlu1 %664, %v216_v11  }
  0x2d   : > { %236 = vperm.xlu0 %663, %v218_v12  }
  0x30   : > { %231 = vperm.xlu1 %664, %v217_v13  }
  0x34   : > { %328 = vrot.lane.b32.xlu1 %v733_v0, %s734_s29 }
  0x38   : > { %332 = vrot.lane.b32.xlu1 %v733_v0, %s734_s29 }
  0x88   : > { %v185_v14 = vpop.permute.xlu0 %184 }
  0x96   : > { %v202_v15 = vpop.permute.xlu1 %201 }
  0x97   : > { %v187_v16 = vpop.permute.xlu0 %186 }
  0x98   : > { %v189_v17 = vsel %vm169_vm0, %v185_v14, %v187_v16 }
  0x99   : > { %191 = vst [vmem:[#allocation4] sm:$0xf] %v189_v17 }
  0x9a   : > { %v204_v18 = vpop.permute.xlu1 %203 }
  0x9b   : > { %v206_v19 = vsel %vm205_vm2, %v202_v15, %v204_v18 }
  0x9c   : > { %208 = vst [vmem:[#allocation4 + $0x8] sm:$0xf] %v206_v19 }
  0xa0   : > { %v213_v20 = vld [vmem:[#allocation4] sm:$0xff] }
  0xa1   : > { %594 = vmatprep.subr.bf16.mxu0 %v213_v20 }
  0xa2   : > { %595 = vmatpush3.bf16.msra.mxu0 %v213_v20 }
  0xa3   : > { %v214_v21 = vld [vmem:[#allocation4 + $0x8] sm:$0xf] }
  0xa4   : > { %618 = vmatprep.subr.msk.bf16.mxu0 %vm256_vm3, %v214_v21  ;;  %v258_v22 = vsel %vm256_vm3, %v214_v21, 0 }
  0xa6   : > { %597 = vmatpush3.bf16.msra.mxu0 %v258_v22 }
  0xa8   : > { %v222_v25 = vpop.permute.xlu0 %221 }
  0xa9   : > { %599 = vmatmul.mubr.msk.bf16.vlgmr.msra.gmra.mrb[0].mxu0 %vm249_vm1, %v666_v23 }
  0xab   : > { %v227_v24 = vpop.permute.xlu1 %226 }
  0xac   : > { %v237_v28 = vpop.permute.xlu0 %236 }
  0xaf   : > { %v232_v26 = vpop.permute.xlu1 %231 }
  0xb3   : > { %v329_v51 = vpop.permute.xlu1 %328 }
  0xb7   : > { %v333_v54 = vpop.permute.xlu1 %332 }
 0x17c   : > { %v600_v27 = vpop.f32.mrb[0].mxu0 }
 0x17d   : > { %v303_v29 = vadd.f32 %v600_v27, %v232_v26  ;;  %v294_v30 = vpop.f32.mrb[1].mxu0 }
 0x17e   : > { %v295_v31 = vadd.f32 %v294_v30, %v222_v25  ;;  %v601_v32 = vpop.f32.mrb[2].mxu0 }
 0x17f   : > { %v306_v33 = vadd.f32 %v601_v32, %v237_v28  ;;  %v297_v34 = vpop.f32.mrb[3].mxu0  ;;  %v311_v36 = vmax.f32 %v303_v29, 0.0 }
 0x180   : > { %v298_v35 = vadd.f32 %v297_v34, %v227_v24  ;;  %v309_v38 = vmax.f32 %v295_v31, 0.0 }
 0x181   : > { %v312_v37 = vmax.f32 %v306_v33, 0.0 }
 0x182   : > { %v310_v39 = vmax.f32 %v298_v35, 0.0 }
 0x183   : > { %v314_v40 = vpack.c.bf16 %v312_v37, %v311_v36 }
 0x184   : > { %v313_v41 = vpack.c.bf16 %v310_v39, %v309_v38 }
 0x185   : > { %316 = vst [vmem:[#allocation3 + $0x20] sm:$0xff] %v314_v40 }
 0x186   : > { %319 = vst.msk [vmem:[#allocation3 + $0x20] sm:$0xff] %vm317_vm4, %v733_v0  ;;  %315 = vst [vmem:[#allocation3 + $0x8] sm:$0xff] %v313_v41 }
 0x187   : > { %318 = vst.msk [vmem:[#allocation3 + $0x8] sm:$0xff] %vm317_vm4, %v733_v0 }
 0x18d   : > { %v348_v42 = vld [vmem:[#allocation3 + $0x20] sm:$0xff] }
 0x18e   : > { %v346_v43 = vld [vmem:[#allocation3 + $0x8] sm:$0xff] }
 0x18f   : > { %354 = vrot.lane.b32.xlu1 %v346_v43, %s735_s30  ;;  %330 = vrot.lane.b32.xlu0 %v346_v43, %s734_s29 }
 0x193   : > { %358 = vrot.lane.b32.xlu1 %v348_v42, %s735_s30  ;;  %334 = vrot.lane.b32.xlu0 %v348_v42, %s734_s29 }
 0x197   : > { %386 = vperm.xlu1 %664, %v568_v44   ;;  %356 = vrot.lane.b32.xlu0 %v347_v45, %s735_s30 }
 0x19b   : > { %396 = vperm.xlu1 %664, %v570_v46   ;;  %360 = vrot.lane.b32.xlu0 %v349_v47, %s735_s30 }
 0x19f   : > { %391 = vperm.xlu0 %663, %v569_v49  }
 0x1a3   : > { %401 = vperm.xlu0 %663, %v571_v50  }
 0x201   : > { %v331_v52 = vpop.permute.xlu0 %330  ;;  %v355_v57 = vpop.permute.xlu1 %354 }
 0x202   : > { %v336_v53 = vsel %vm169_vm0, %v329_v51, %v331_v52 }
 0x203   : > { %340 = vst [vmem:[#allocation4] sm:$0xff] %v336_v53  ;;  %602 = vmatprep.subr.bf16.mxu1 %v336_v53 }
 0x204   : > { %603 = vmatpush3.bf16.msra.mxu1 %v336_v53 }
 0x205   : > { %v335_v55 = vpop.permute.xlu0 %334  ;;  %v359_v60 = vpop.permute.xlu1 %358 }
 0x206   : > { %v337_v56 = vsel %vm169_vm0, %v333_v54, %v335_v55 }
 0x207   : > { %341 = vst [vmem:[#allocation4 + $0x8] sm:$0xff] %v337_v56  ;;  %604 = vmatprep.subr.bf16.mxu1 %v337_v56 }
 0x208   : > { %605 = vmatpush3.bf16.msra.mxu1 %v337_v56 }
 0x209   : > { %v357_v58 = vpop.permute.xlu0 %356  ;;  %606 = vmatprep.subr.bf16.mxu1 %v346_v43 }
 0x20a   : > { %v362_v59 = vsel %vm205_vm2, %v355_v57, %v357_v58 }
 0x20c   : > { %607 = vmatpush3.bf16.msra.mxu1 %v346_v43 }
 0x20d   : > { %v361_v61 = vpop.permute.xlu0 %360  ;;  %608 = vmatprep.subr.bf16.mxu1 %v348_v42 }
 0x20e   : > { %v363_v62 = vsel %vm205_vm2, %v359_v60, %v361_v61 }
 0x210   : > { %609 = vmatpush3.bf16.msra.mxu1 %v348_v42 }
 0x211   : > { %610 = vmatprep.subr.bf16.mxu1 %v362_v59 }
 0x214   : > { %611 = vmatpush3.bf16.msra.mxu1 %v362_v59 }
 0x215   : > { %612 = vmatprep.subr.bf16.mxu1 %v363_v62 }
 0x216   : > { %v387_v0 = vpop.permute.xlu1 %386 }
 0x218   : > { %613 = vmatpush3.bf16.msra.mxu1 %v363_v62 }
 0x21a   : > { %v397_v2 = vpop.permute.xlu1 %396 }
 0x21b   : > { %615 = vmatmul.mubr.msk.bf16.vlgmr.msra.gmra.mrb[0].mxu1 %vm414_vm5, %v668_v63 }
 0x21e   : > { %v392_v1 = vpop.permute.xlu0 %391 }
 0x222   : > { %v402_v6 = vpop.permute.xlu0 %401 }
 0x2ee   : > { %v616_v3 = vpop.f32.mrb[0].mxu1 }
 0x2ef   : > { %v464_v4 = vadd.f32 %v616_v3, %v397_v2  ;;  %v455_v5 = vpop.f32.mrb[1].mxu1 }
 0x2f0   : > { %v456_v7 = vadd.f32 %v455_v5, %v387_v0  ;;  %v617_v8 = vpop.f32.mrb[2].mxu1 }
 0x2f1   : > { %v472_v9 = vmax.f32 %v464_v4, 0.0  ;;  %v467_v10 = vadd.f32 %v617_v8, %v402_v6  ;;  %v458_v11 = vpop.f32.mrb[3].mxu1 }
 0x2f2   : > { %v470_v12 = vmax.f32 %v456_v7, 0.0  ;;  %v459_v13 = vadd.f32 %v458_v11, %v392_v1 }
 0x2f3   : > { %476 = vst [vmem:[%s161_s17 + $0x10] sm:$0xff] %v472_v9  ;;  %v473_v14 = vmax.f32 %v467_v10, 0.0 }
 0x2f4   : > { %474 = vst [vmem:[%s161_s17] sm:$0xff] %v470_v12  ;;  %v471_v15 = vmax.f32 %v459_v13, 0.0 }
 0x2f5   : > { %477 = vst [vmem:[%s161_s17 + $0x18] sm:$0xff] %v473_v14 }
 0x2f6   : > { %475 = vst [vmem:[%s161_s17 + $0x8] sm:$0xff] %v471_v15 }
 0x2f7   : > { %682 = shalt.err (!%p679_p3)
}
 0x2f8   : > { %s683_s29 = scalar_lea.hbm %s891_s26, 512  ;;  %s687_s8 = scalar_lea.hbm %s937_s3, 1024 }
 0x2f9   : > { %p684_p4 = scmp.ne.s32.totalorder %s891_s26, %s683_s29  ;;  %p688_p9 = scmp.lt.u32.totalorder %s891_s26, %s937_s3 }
 0x2fa   : > { %p689_p10 = scmp.lt.u32.totalorder %s687_s8, %s683_s29  ;;  %p691_p12 = scmp.lt.u32.totalorder %s683_s29, %s891_s26 }
 0x2fb   : > { %p685_p7 = pnand %p684_p4, %p797_p5 }
 0x2fc   : > { %p690_p11 = por %p689_p10, %p688_p9 }
 0x2fd   : > { %p686_p8 = pneg %p685_p7 }
 0x2fe   : > { %p692_p13 = por %p691_p12, %p690_p11 }
 0x300   : > { %p693_p0 = pnand %p692_p13, %p686_p8 }
 0x302   : > { %696 = shalt.err (!%p693_p0)
}
 0x303   : > { %s737_s10 = smov 128   ;;  %s738_s11 = smov 8  }
 0x304   : > { %619 = dma.vmem_to_hbm [thread:$0]  (%p797_p5), %s886_s19, 512, %s891_s26, %s893_s16, %s737_s10, %s737_s10, %s738_s11  }
 0x305 PF: > { %p625_p1 = scmp.ge.s32.totalorder %s731_s15, 2  ;;  %s507_s17 = sand.u32 1, %s719_s12  }
 0x306   : > { %s508_s20 = scalar_lea.sflag [#allocation6], %s507_s17 }
 0x307   : > { %p622_p2 = pnand %p625_p1, %p801_p6 }
 0x309   : > { %714 = dma.done.wait (!%p622_p2), %s508_s20, 512  }
 0x30a   : > { %716 = vsyncadd (!%p622_p2), %s508_s20, 4294966784  ;;  %p13_p3 = scmp.ge.s32.totalorder %s784_s18, 4   ;;  %s940_s12 = smov %s723_s13 }
 0x30b   : > { %s941_s13 = smov %s727_s14  ;;  %s942_s14 = smov %s795_s21 }
 0x30c   : > { %s943_s15 = smov %s784_s18  ;;  %15 = sbr.rel (!%p13_p3) target bundleno = 3 (0x3), region = 69 }
 0x313   :  { %513 = vsyncpa [#allocation6], 1 }
 0x314   :  { %515 = vsyncpa [#allocation6 + $0x1], 1 }

</bundles_post_ra>
